<compile_context>
chip_gen: v5e
topology: v5e:2x2
jax: 0.10.0
libtpu: 0.0.40
codegen_flags: <defaults>
</compile_context>

<pallas_src>
import jax
import jax.numpy as jnp
from jax import lax
from jax.experimental import pallas as pl
from jax.experimental.pallas import tpu as pltpu


def _round_up(x, m):
    return (x + m - 1) // m * m


def _pick_tile_m(m_total, target=1024):
    """Flat-M tile size: as large as possible up to `target`, sublane-aligned."""
    if m_total <= target:
        return max(8, _round_up(m_total, 8))
    return target


def _matmul_bias_relu_kernel(x_ref, w_ref, b_ref, o_ref):
    # x_ref: (TILE_M, K)        bf16  im2col'd input rows (K left unpadded)
    # w_ref: (K, COUT_PAD)      bf16  BN-scale-folded conv weights
    # b_ref: (1, COUT_PAD)      f32   folded conv-bias + BN shift
    # o_ref: (TILE_M, COUT_PAD) bf16
    acc = jnp.dot(x_ref[...], w_ref[...], preferred_element_type=jnp.float32)
    o_ref[...] = jnp.maximum(acc + b_ref[...], 0.0).astype(o_ref.dtype)


def conv_bn_relu(x_nchw, weight, conv_bias, bn_gamma, bn_beta, bn_mean,
                 bn_var, *, stride=1, padding=1, eps=1e-5):
    """Fused Conv2d + BatchNorm2d(eval) + ReLU.

    x_nchw: (N, Cin, H, W)   weight: (Cout, Cin, KH, KW)   (PyTorch layouts)
    Returns (N, Cout, Hout, Wout) float32.
    """
    n, cin, h, w = x_nchw.shape
    cout, _, kh, kw = weight.shape
    h_out = (h + 2 * padding - kh) // stride + 1
    w_out = (w + 2 * padding - kw) // stride + 1

    # ---- glue / folding in plain JAX (layout + BN fold + im2col) ----------
    x_nhwc = jnp.transpose(x_nchw, (0, 2, 3, 1)).astype(jnp.float32)
    x_pad = jnp.pad(
        x_nhwc, ((0, 0), (padding, padding), (padding, padding), (0, 0)))

    # im2col: (N, H_out, W_out, KH*KW*Cin), tap order (kh, kw, cin).
    cols = []
    for dh in range(kh):
        for dw in range(kw):
            cols.append(x_pad[:, dh:dh + stride * h_out:stride,
                              dw:dw + stride * w_out:stride, :])
    x_col = jnp.concatenate(cols, axis=-1)

    k = kh * kw * cin                      # contraction dim, NOT padded to 128
    cout_pad = _round_up(cout, 128)        # lane-dense N / output stores

    # Flatten M = N*H_out*W_out and pad to a multiple of the tile.
    m_total = n * h_out * w_out
    tile_m = _pick_tile_m(m_total)
    m_pad = _round_up(m_total, tile_m)

    x_col = x_col.reshape(m_total, k).astype(jnp.bfloat16)
    x_col = jnp.pad(x_col, ((0, m_pad - m_total), (0, 0)))

    # BN fold: scale into weights, shift into bias.
    inv_std = lax.rsqrt(bn_var.astype(jnp.float32) + eps)
    scale = bn_gamma.astype(jnp.float32) * inv_std                    # (Cout,)
    bias = (bn_beta.astype(jnp.float32)
            + (conv_bias.astype(jnp.float32)
               - bn_mean.astype(jnp.float32)) * scale)                # (Cout,)

    w_hwio = jnp.transpose(weight, (2, 3, 1, 0)).astype(jnp.float32)  # KH,KW,Ci,Co
    w_folded = w_hwio * scale.reshape(1, 1, 1, cout)
    w_mat = w_folded.reshape(k, cout)
    w_mat = jnp.pad(w_mat, ((0, 0), (0, cout_pad - cout))).astype(jnp.bfloat16)
    bias_mat = jnp.pad(bias, (0, cout_pad - cout)).reshape(1, cout_pad)

    grid = (m_pad // tile_m,)

    cost = pl.CostEstimate(
        flops=2 * m_pad * k * cout_pad,
        transcendentals=0,
        bytes_accessed=(m_pad * k * 2          # bf16 input rows
                        + k * cout_pad * 2     # bf16 weights (fetched once)
                        + cout_pad * 4         # f32 bias
                        + m_pad * cout_pad * 2))  # bf16 output

    out_flat = pl.pallas_call(
        _matmul_bias_relu_kernel,
        out_shape=jax.ShapeDtypeStruct((m_pad, cout_pad), jnp.bfloat16),
        grid_spec=pltpu.PrefetchScalarGridSpec(
            num_scalar_prefetch=0,
            grid=grid,
            in_specs=[
                # Input: last dim == full array dim (k), so no HBM zero-pad.
                pl.BlockSpec((tile_m, k), lambda i: (i, 0)),
                # Weights / bias: constant index map -> single fetch, resident.
                pl.BlockSpec((k, cout_pad), lambda i: (0, 0)),
                pl.BlockSpec((1, cout_pad), lambda i: (0, 0)),
            ],
            out_specs=pl.BlockSpec((tile_m, cout_pad), lambda i: (i, 0)),
        ),
        compiler_params=pltpu.CompilerParams(
            dimension_semantics=("parallel",)),
        cost_estimate=cost,
    )(x_col, w_mat, bias_mat)

    # Slice off M / Cout padding, restore PyTorch NCHW f32 interface.
    out_nhwc = out_flat[:m_total, :cout].reshape(n, h_out, w_out, cout)
    return jnp.transpose(out_nhwc, (0, 3, 1, 2)).astype(jnp.float32)


def _reference(x_nchw, weight, conv_bias, bn_gamma, bn_beta, bn_mean, bn_var,
               *, stride=1, padding=1, eps=1e-5):
    y = lax.conv_general_dilated(
        x_nchw.astype(jnp.float32), weight.astype(jnp.float32),
        window_strides=(stride, stride),
        padding=[(padding, padding), (padding, padding)],
        dimension_numbers=("NCHW", "OIHW", "NCHW"))
    y = y + conv_bias.reshape(1, -1, 1, 1)
    inv_std = lax.rsqrt(bn_var + eps)
    y = (y - bn_mean.reshape(1, -1, 1, 1)) * (bn_gamma * inv_std).reshape(
        1, -1, 1, 1) + bn_beta.reshape(1, -1, 1, 1)
    return jnp.maximum(y, 0.0)


if __name__ == "__main__":
    key = jax.random.PRNGKey(0)
    k_x, k_w, k_b, k_g, k_be, k_m, k_v = jax.random.split(key, 7)

    N, Cin, H, W = 2, 4, 16, 16
    Cout, KH, KW = 8, 3, 3

    x = jax.random.normal(k_x, (N, Cin, H, W), dtype=jnp.float32)
    weight = jax.random.normal(k_w, (Cout, Cin, KH, KW), dtype=jnp.float32) * 0.1
    conv_bias = jax.random.normal(k_b, (Cout,), dtype=jnp.float32) * 0.1
    bn_gamma = 1.0 + 0.1 * jax.random.normal(k_g, (Cout,), dtype=jnp.float32)
    bn_beta = 0.1 * jax.random.normal(k_be, (Cout,), dtype=jnp.float32)
    bn_mean = 0.1 * jax.random.normal(k_m, (Cout,), dtype=jnp.float32)
    bn_var = jnp.abs(jax.random.normal(k_v, (Cout,), dtype=jnp.float32)) + 0.5

    # stride=1 (the standard 3x3 "same" conv block).
    out = conv_bn_relu(x, weight, conv_bias, bn_gamma, bn_beta, bn_mean,
                       bn_var, stride=1, padding=1)
    out = jax.block_until_ready(out)
    ref = _reference(x, weight, conv_bias, bn_gamma, bn_beta, bn_mean, bn_var,
                     stride=1, padding=1)
    assert out.shape == (N, Cout, H, W)
    # bf16 inputs / f32 accumulation / bf16 output -> relaxed tolerance.
    assert jnp.allclose(out, ref, atol=3e-2, rtol=3e-2)

    # stride=2 (MobileNet downsampling variant of the same block).
    out2 = conv_bn_relu(x, weight, conv_bias, bn_gamma, bn_beta, bn_mean,
                        bn_var, stride=2, padding=1)
    out2 = jax.block_until_ready(out2)
    ref2 = _reference(x, weight, conv_bias, bn_gamma, bn_beta, bn_mean, bn_var,
                      stride=2, padding=1)
    assert out2.shape == (N, Cout, H // 2, W // 2)
    assert jnp.allclose(out2, ref2, atol=3e-2, rtol=3e-2)

    print("KERNEL_OK")
</pallas_src>

<mosaic_0001>
module attributes {stable_mosaic.version = 11 : i64} {
  func.func @_matmul_bias_relu_kernel(%arg0: i32, %arg1: memref<512x36xbf16, #tpu.memory_space<vmem>>, %arg2: memref<36x128xbf16, #tpu.memory_space<vmem>>, %arg3: memref<1x128xf32, #tpu.memory_space<vmem>>, %arg4: memref<512x128xbf16, #tpu.memory_space<vmem>>) attributes {dimension_semantics = [#tpu.dimension_semantics<parallel>], iteration_bounds = array<i64: 1>, scalar_prefetch = 0 : i64, scratch_operands = 0 : i64, tpu.core_type = #tpu.core_type<tc>, window_params = [{transform_indices = @transform_0, window_bounds = array<i64: 512, 36>}, {pipeline_mode = #tpu.pipeline_mode<synchronous>, transform_indices = @transform_1, window_bounds = array<i64: 36, 128>}, {pipeline_mode = #tpu.pipeline_mode<synchronous>, transform_indices = @transform_2, window_bounds = array<i64: 1, 128>}, {transform_indices = @transform_3, window_bounds = array<i64: 512, 128>}]} {
    %c0 = arith.constant 0 : index
    %c0_0 = arith.constant 0 : index
    %0 = vector.load %arg1[%c0, %c0_0] : memref<512x36xbf16, #tpu.memory_space<vmem>>, vector<512x36xbf16>
    %c0_1 = arith.constant 0 : index
    %c0_2 = arith.constant 0 : index
    %1 = vector.load %arg2[%c0_1, %c0_2] : memref<36x128xbf16, #tpu.memory_space<vmem>>, vector<36x128xbf16>
    %cst = arith.constant dense<0.000000e+00> : vector<512x128xf32>
    %2 = tpu.matmul %0, %1, %cst {dimension_numbers = #tpu.dot_dimension_numbers<[1], [0], [0], [1], [0, 0, 1, 1], [], []>} : vector<512x36xbf16>, vector<36x128xbf16>, vector<512x128xf32> -> vector<512x128xf32>
    %c0_3 = arith.constant 0 : index
    %c0_4 = arith.constant 0 : index
    %3 = vector.load %arg3[%c0_3, %c0_4] : memref<1x128xf32, #tpu.memory_space<vmem>>, vector<1x128xf32>
    %4 = vector.broadcast %3 : vector<1x128xf32> to vector<512x128xf32>
    %5 = arith.addf %2, %4 : vector<512x128xf32>
    %cst_5 = arith.constant 0.000000e+00 : f32
    %6 = vector.broadcast %cst_5 : f32 to vector<512x128xf32>
    %7 = arith.maximumf %5, %6 : vector<512x128xf32>
    %8 = arith.truncf %7 : vector<512x128xf32> to vector<512x128xbf16>
    %c0_6 = arith.constant 0 : index
    %c0_7 = arith.constant 0 : index
    %9 = vector.load %arg4[%c0_6, %c0_7] : memref<512x128xbf16, #tpu.memory_space<vmem>>, vector<512x128xbf16>
    tpu.vector_store %arg4[%c0_6, %c0_7], %8 {strides = array<i32>} : memref<512x128xbf16, #tpu.memory_space<vmem>>, vector<512x128xbf16>,
    return
  }
  func.func @transform_0(%arg0: i32) -> (i32, i32) {
    %c0_i32 = arith.constant 0 : i32
    %c0_i32_0 = arith.constant 0 : i32
    return %arg0, %c0_i32 : i32, i32
  }
  func.func @transform_1(%arg0: i32) -> (i32, i32) {
    %c0_i32 = arith.constant 0 : i32
    %c0_i32_0 = arith.constant 0 : i32
    %c0_i32_1 = arith.constant 0 : i32
    return %c0_i32, %c0_i32_0 : i32, i32
  }
  func.func @transform_2(%arg0: i32) -> (i32, i32) {
    %c0_i32 = arith.constant 0 : i32
    %c0_i32_0 = arith.constant 0 : i32
    %c0_i32_1 = arith.constant 0 : i32
    return %c0_i32, %c0_i32_0 : i32, i32
  }
  func.func @transform_3(%arg0: i32) -> (i32, i32) {
    %c0_i32 = arith.constant 0 : i32
    %c0_i32_0 = arith.constant 0 : i32
    return %arg0, %c0_i32 : i32, i32
  }
}

</mosaic_0001>

<bundles_post_ra>
// kernel: tpu_custom_call.1
= control target key start
LH: loop header
LB: loop body
LE: loop exit
PB: predicated region body
PF: predicated region fallthrough
CT: control target
= control target key end

     0   :  { %vm361_vm0 = vcmask 1041408   ;;  %s1408_s0 = inlined_call_operand.vmem [shape: bf16[512,36], index: 0, kind: input, shape index: {}]   ;;  %s1409_s1 = inlined_call_operand.vmem [shape: bf16[36,128], index: 1, kind: input, shape index: {}]   ;;  %s1410_s2 = inlined_call_operand.vmem [shape: f32[1,128], index: 2, kind: input, shape index: {}]   ;;  %s1411_s3 = inlined_call_operand.hbm [shape: bf16[512,128], index: 3, kind: output, shape index: {}]  }
   0x1   :  { %v84_v0 = vld [vmem:[%s1409_s1 + $0x10] sm:$0x3] }
   0x2   :  { %v258_v1 = vunpack.c.l.b16 %v84_v0 }
   0x4   :  { %v261_v2 = vpack.c.b16 %v258_v1, %v258_v1 }
   0x5   :  { %8 = vsyncpa [#allocation3], 0  ;;  %v945_v4 = vld [vmem:[%s1409_s1 + $0x8] sm:$0xff]  ;;  %v944_v5 = vld [vmem:[%s1409_s1] sm:$0xff]  ;;  %vm264_vm1 = vcmask 293888   ;;  %s732_s29 = sshll.u32 %s1411_s3, 4  ;;  %s733_s29 = int_to_ptr.hbm [resolvable:$true] %s732_s29 }
   0x6   :  { %v363_v3 = vsel %vm361_vm0, %v261_v2, 0  ;;  %v912_v6 = vld [vmem:[%s1408_s0] sm:$0xff]  ;;  %v913_v10 = vld [vmem:[%s1408_s0 + $0x8] sm:$0xff]  ;;  %v914_v14 = vld [vmem:[%s1408_s0 + $0x10] sm:$0xff]  ;;  %s1177_s30 = smov 64   ;;  %s1178_s4 = smov 4  }
   0x7   :  { %370 = vmatpush.bf16.msra.mxu0 %v363_v3  ;;  %1137 = vmatpush.bf16.msra.mxu1 %v363_v3  ;;  %v920_v7 = vld [vmem:[%s1408_s0 + $0x40] sm:$0xff]  ;;  %v921_v11 = vld [vmem:[%s1408_s0 + $0x48] sm:$0xff]  ;;  %v922_v15 = vld [vmem:[%s1408_s0 + $0x50] sm:$0xff] }
   0x8   :  { %1138 = vmatpush.bf16.msra.mxu2 %v363_v3  ;;  %1139 = vmatpush.bf16.msra.mxu3 %v363_v3  ;;  %v928_v8 = vld [vmem:[%s1408_s0 + $0x80] sm:$0xff]  ;;  %v929_v12 = vld [vmem:[%s1408_s0 + $0x88] sm:$0xff]  ;;  %v930_v16 = vld [vmem:[%s1408_s0 + $0x90] sm:$0xff] }
   0x9   :  { %v936_v9 = vld [vmem:[%s1408_s0 + $0xc0] sm:$0xff]  ;;  %v937_v13 = vld [vmem:[%s1408_s0 + $0xc8] sm:$0xff]  ;;  %v938_v17 = vld [vmem:[%s1408_s0 + $0xd0] sm:$0xff] }
   0xa   :  { %v915_v18 = vld [vmem:[%s1408_s0 + $0x18] sm:$0xff]  ;;  %v916_v22 = vld [vmem:[%s1408_s0 + $0x20] sm:$0xff]  ;;  %v917_v26 = vld [vmem:[%s1408_s0 + $0x28] sm:$0xff] }
   0xb   :  { %371 = vmatpush.bf16.msra.mxu0 %v945_v4  ;;  %1140 = vmatpush.bf16.msra.mxu1 %v945_v4  ;;  %v923_v19 = vld [vmem:[%s1408_s0 + $0x58] sm:$0xff]  ;;  %v924_v23 = vld [vmem:[%s1408_s0 + $0x60] sm:$0xff]  ;;  %v925_v27 = vld [vmem:[%s1408_s0 + $0x68] sm:$0xff] }
   0xc   :  { %1141 = vmatpush.bf16.msra.mxu2 %v945_v4  ;;  %1142 = vmatpush.bf16.msra.mxu3 %v945_v4  ;;  %v931_v20 = vld [vmem:[%s1408_s0 + $0x98] sm:$0xff]  ;;  %v932_v24 = vld [vmem:[%s1408_s0 + $0xa0] sm:$0xff]  ;;  %v933_v28 = vld [vmem:[%s1408_s0 + $0xa8] sm:$0xff] }
   0xd   :  { %v939_v21 = vld [vmem:[%s1408_s0 + $0xd8] sm:$0xff]  ;;  %v940_v25 = vld [vmem:[%s1408_s0 + $0xe0] sm:$0xff]  ;;  %v941_v29 = vld [vmem:[%s1408_s0 + $0xe8] sm:$0xff] }
   0xe   :  { %v918_v30 = vld [vmem:[%s1408_s0 + $0x30] sm:$0xff]  ;;  %v919_v34 = vld [vmem:[%s1408_s0 + $0x38] sm:$0xff]  ;;  %v1339_v40 = vld [vmem:[%s1410_s2] ss:$0 sm:$0xff] }
   0xf   :  { %372 = vmatpush.bf16.msra.mxu0 %v944_v5  ;;  %1143 = vmatpush.bf16.msra.mxu1 %v944_v5  ;;  %v926_v31 = vld [vmem:[%s1408_s0 + $0x70] sm:$0xff]  ;;  %v927_v35 = vld [vmem:[%s1408_s0 + $0x78] sm:$0xff] }
  0x10   :  { %1144 = vmatpush.bf16.msra.mxu2 %v944_v5  ;;  %1145 = vmatpush.bf16.msra.mxu3 %v944_v5  ;;  %v934_v32 = vld [vmem:[%s1408_s0 + $0xb0] sm:$0xff]  ;;  %v935_v36 = vld [vmem:[%s1408_s0 + $0xb8] sm:$0xff] }
  0x11   :  { %v942_v33 = vld [vmem:[%s1408_s0 + $0xf0] sm:$0xff]  ;;  %v943_v37 = vld [vmem:[%s1408_s0 + $0xf8] sm:$0xff]  ;;  %s1176_s0 = smov [#allocation2]  }
  0x12   :  { %880 = vmatmul.msk.bf16.vlgmr.msra.gmra.mxu0 %vm264_vm1, %v912_v6  ;;  %888 = vmatmul.msk.bf16.vlgmr.msra.gmra.mxu1 %vm264_vm1, %v920_v7  ;;  %s730_s2 = sshll.u32 %s1176_s0, 4  ;;  %s731_s2 = int_to_ptr.vmem [resolvable:$true] %s730_s2 }
  0x13   :  { %896 = vmatmul.msk.bf16.vlgmr.msra.gmra.mxu2 %vm264_vm1, %v928_v8  ;;  %904 = vmatmul.msk.bf16.vlgmr.msra.gmra.mxu3 %vm264_vm1, %v936_v9 }
  0x22   :  { %881 = vmatmul.msk.bf16.gmra.mxu0 %vm264_vm1, %v913_v10  ;;  %889 = vmatmul.msk.bf16.gmra.mxu1 %vm264_vm1, %v921_v11 }
  0x23   :  { %897 = vmatmul.msk.bf16.gmra.mxu2 %vm264_vm1, %v929_v12  ;;  %905 = vmatmul.msk.bf16.gmra.mxu3 %vm264_vm1, %v937_v13 }
  0x32   :  { %882 = vmatmul.msk.bf16.gmra.mxu0 %vm264_vm1, %v914_v14  ;;  %890 = vmatmul.msk.bf16.gmra.mxu1 %vm264_vm1, %v922_v15 }
  0x33   :  { %898 = vmatmul.msk.bf16.gmra.mxu2 %vm264_vm1, %v930_v16  ;;  %906 = vmatmul.msk.bf16.gmra.mxu3 %vm264_vm1, %v938_v17 }
  0x42   :  { %883 = vmatmul.msk.bf16.gmra.mxu0 %vm264_vm1, %v915_v18  ;;  %891 = vmatmul.msk.bf16.gmra.mxu1 %vm264_vm1, %v923_v19 }
  0x43   :  { %899 = vmatmul.msk.bf16.gmra.mxu2 %vm264_vm1, %v931_v20  ;;  %907 = vmatmul.msk.bf16.gmra.mxu3 %vm264_vm1, %v939_v21 }
  0x52   :  { %884 = vmatmul.msk.bf16.gmra.mxu0 %vm264_vm1, %v916_v22  ;;  %892 = vmatmul.msk.bf16.gmra.mxu1 %vm264_vm1, %v924_v23 }
  0x53   :  { %900 = vmatmul.msk.bf16.gmra.mxu2 %vm264_vm1, %v932_v24  ;;  %908 = vmatmul.msk.bf16.gmra.mxu3 %vm264_vm1, %v940_v25 }
  0x62   :  { %885 = vmatmul.msk.bf16.gmra.mxu0 %vm264_vm1, %v917_v26  ;;  %893 = vmatmul.msk.bf16.gmra.mxu1 %vm264_vm1, %v925_v27 }
  0x63   :  { %901 = vmatmul.msk.bf16.gmra.mxu2 %vm264_vm1, %v933_v28  ;;  %909 = vmatmul.msk.bf16.gmra.mxu3 %vm264_vm1, %v941_v29 }
  0x72   :  { %886 = vmatmul.msk.bf16.gmra.mxu0 %vm264_vm1, %v918_v30  ;;  %894 = vmatmul.msk.bf16.gmra.mxu1 %vm264_vm1, %v926_v31 }
  0x73   :  { %902 = vmatmul.msk.bf16.gmra.mxu2 %vm264_vm1, %v934_v32  ;;  %910 = vmatmul.msk.bf16.gmra.mxu3 %vm264_vm1, %v942_v33 }
  0x82   :  { %887 = vmatmul.msk.bf16.gmra.mxu0 %vm264_vm1, %v919_v34  ;;  %895 = vmatmul.msk.bf16.gmra.mxu1 %vm264_vm1, %v927_v35 }
  0x83   :  { %903 = vmatmul.msk.bf16.gmra.mxu2 %vm264_vm1, %v935_v36  ;;  %911 = vmatmul.msk.bf16.gmra.mxu3 %vm264_vm1, %v943_v37 }
  0x8f   :  { %v374_v38 = vpop.f32.mrf.mxu0  ;;  %v414_v39 = vpop.f32.mrf.mxu1 }
  0x90   :  { %v375_v41 = vadd.f32 %v1339_v40, %v374_v38  ;;  %v415_v42 = vadd.f32 %v1339_v40, %v414_v39 }
  0x92   :  { %v534_v49 = vmax.f32 %v375_v41, 0.0  ;;  %v550_v50 = vmax.f32 %v415_v42, 0.0 }
  0x96   :  { %v454_v43 = vpop.f32.mrf.mxu2  ;;  %v494_v44 = vpop.f32.mrf.mxu3 }
  0x97   :  { %v376_v45 = vpop.f32.mrf.mxu0  ;;  %v416_v46 = vpop.f32.mrf.mxu1  ;;  %v455_v55 = vadd.f32 %v1339_v40, %v454_v43  ;;  %v495_v56 = vadd.f32 %v1339_v40, %v494_v44 }
  0x98   :  { %v377_v47 = vadd.f32 %v1339_v40, %v376_v45  ;;  %v417_v48 = vadd.f32 %v1339_v40, %v416_v46 }
  0x99   :  { %v566_v63 = vmax.f32 %v455_v55, 0.0  ;;  %v582_v0 = vmax.f32 %v495_v56, 0.0 }
  0x9a   :  { %v535_v51 = vmax.f32 %v377_v47, 0.0  ;;  %v551_v52 = vmax.f32 %v417_v48, 0.0 }
  0x9c   :  { %v949_v53 = vpack.c.bf16 %v535_v51, %v534_v49  ;;  %v989_v54 = vpack.c.bf16 %v551_v52, %v550_v50 }
  0x9e   :  { %950 = vst [vmem:[#allocation2] sm:$0xff] %v949_v53   ;;  %v456_v57 = vpop.f32.mrf.mxu2  ;;  %v496_v58 = vpop.f32.mrf.mxu3 }
  0x9f   :  { %1113 = vst [vmem:[#allocation2 + $0x40] sm:$0xff] %v989_v54   ;;  %v457_v59 = vadd.f32 %v1339_v40, %v456_v57  ;;  %v497_v60 = vadd.f32 %v1339_v40, %v496_v58  ;;  %v379_v61 = vpop.f32.mrf.mxu0  ;;  %v419_v62 = vpop.f32.mrf.mxu1 }
  0xa0   :  { %v380_v5 = vadd.f32 %v1339_v40, %v379_v61  ;;  %v420_v6 = vadd.f32 %v1339_v40, %v419_v62 }
  0xa1   :  { %v567_v1 = vmax.f32 %v457_v59, 0.0  ;;  %v583_v2 = vmax.f32 %v497_v60, 0.0 }
  0xa2   :  { %v536_v13 = vmax.f32 %v380_v5, 0.0  ;;  %v552_v14 = vmax.f32 %v420_v6, 0.0 }
  0xa3   :  { %v1029_v3 = vpack.c.bf16 %v567_v1, %v566_v63  ;;  %v1069_v4 = vpack.c.bf16 %v583_v2, %v582_v0 }
  0xa5   :  { %1121 = vst [vmem:[#allocation2 + $0x80] sm:$0xff] %v1029_v3  }
  0xa6   :  { %1129 = vst [vmem:[#allocation2 + $0xc0] sm:$0xff] %v1069_v4   ;;  %v459_v7 = vpop.f32.mrf.mxu2  ;;  %v499_v8 = vpop.f32.mrf.mxu3 }
  0xa7   :  { %v381_v9 = vpop.f32.mrf.mxu0  ;;  %v421_v10 = vpop.f32.mrf.mxu1  ;;  %v460_v19 = vadd.f32 %v1339_v40, %v459_v7  ;;  %v500_v20 = vadd.f32 %v1339_v40, %v499_v8 }
  0xa8   :  { %v382_v11 = vadd.f32 %v1339_v40, %v381_v9  ;;  %v422_v12 = vadd.f32 %v1339_v40, %v421_v10 }
  0xa9   :  { %v568_v27 = vmax.f32 %v460_v19, 0.0  ;;  %v584_v28 = vmax.f32 %v500_v20, 0.0 }
  0xaa   :  { %v537_v15 = vmax.f32 %v382_v11, 0.0  ;;  %v553_v16 = vmax.f32 %v422_v12, 0.0 }
  0xac   :  { %v954_v17 = vpack.c.bf16 %v537_v15, %v536_v13  ;;  %v994_v18 = vpack.c.bf16 %v553_v16, %v552_v14 }
  0xae   :  { %1106 = vst [vmem:[#allocation2 + $0x8] sm:$0xff] %v954_v17   ;;  %v461_v21 = vpop.f32.mrf.mxu2  ;;  %v501_v22 = vpop.f32.mrf.mxu3 }
  0xaf   :  { %1114 = vst [vmem:[#allocation2 + $0x48] sm:$0xff] %v994_v18   ;;  %v462_v23 = vadd.f32 %v1339_v40, %v461_v21  ;;  %v502_v24 = vadd.f32 %v1339_v40, %v501_v22  ;;  %v384_v25 = vpop.f32.mrf.mxu0  ;;  %v424_v26 = vpop.f32.mrf.mxu1 }
  0xb0   :  { %v385_v33 = vadd.f32 %v1339_v40, %v384_v25  ;;  %v425_v34 = vadd.f32 %v1339_v40, %v424_v26 }
  0xb1   :  { %v569_v29 = vmax.f32 %v462_v23, 0.0  ;;  %v585_v30 = vmax.f32 %v502_v24, 0.0 }
  0xb2   :  { %v538_v42 = vmax.f32 %v385_v33, 0.0  ;;  %v554_v43 = vmax.f32 %v425_v34, 0.0 }
  0xb3   :  { %v1034_v31 = vpack.c.bf16 %v569_v29, %v568_v27  ;;  %v1074_v32 = vpack.c.bf16 %v585_v30, %v584_v28 }
  0xb5   :  { %1122 = vst [vmem:[#allocation2 + $0x88] sm:$0xff] %v1034_v31  }
  0xb6   :  { %1130 = vst [vmem:[#allocation2 + $0xc8] sm:$0xff] %v1074_v32   ;;  %v464_v35 = vpop.f32.mrf.mxu2  ;;  %v504_v36 = vpop.f32.mrf.mxu3 }
  0xb7   :  { %v386_v37 = vpop.f32.mrf.mxu0  ;;  %v426_v38 = vpop.f32.mrf.mxu1  ;;  %v465_v48 = vadd.f32 %v1339_v40, %v464_v35  ;;  %v505_v49 = vadd.f32 %v1339_v40, %v504_v36 }
  0xb8   :  { %v387_v39 = vadd.f32 %v1339_v40, %v386_v37  ;;  %v427_v41 = vadd.f32 %v1339_v40, %v426_v38 }
  0xb9   :  { %v570_v56 = vmax.f32 %v465_v48, 0.0  ;;  %v586_v57 = vmax.f32 %v505_v49, 0.0 }
  0xba   :  { %v539_v44 = vmax.f32 %v387_v39, 0.0  ;;  %v555_v45 = vmax.f32 %v427_v41, 0.0 }
  0xbc   :  { %v959_v46 = vpack.c.bf16 %v539_v44, %v538_v42  ;;  %v999_v47 = vpack.c.bf16 %v555_v45, %v554_v43 }
  0xbe   :  { %1107 = vst [vmem:[#allocation2 + $0x10] sm:$0xff] %v959_v46   ;;  %v466_v50 = vpop.f32.mrf.mxu2  ;;  %v506_v51 = vpop.f32.mrf.mxu3 }
  0xbf   :  { %1115 = vst [vmem:[#allocation2 + $0x50] sm:$0xff] %v999_v47   ;;  %v467_v52 = vadd.f32 %v1339_v40, %v466_v50  ;;  %v507_v53 = vadd.f32 %v1339_v40, %v506_v51  ;;  %v389_v54 = vpop.f32.mrf.mxu0  ;;  %v429_v55 = vpop.f32.mrf.mxu1 }
  0xc0   :  { %v390_v62 = vadd.f32 %v1339_v40, %v389_v54  ;;  %v430_v63 = vadd.f32 %v1339_v40, %v429_v55 }
  0xc1   :  { %v571_v58 = vmax.f32 %v467_v52, 0.0  ;;  %v587_v59 = vmax.f32 %v507_v53, 0.0 }
  0xc2   :  { %v540_v6 = vmax.f32 %v390_v62, 0.0  ;;  %v556_v7 = vmax.f32 %v430_v63, 0.0 }
  0xc3   :  { %v1039_v60 = vpack.c.bf16 %v571_v58, %v570_v56  ;;  %v1079_v61 = vpack.c.bf16 %v587_v59, %v586_v57 }
  0xc5   :  { %1123 = vst [vmem:[#allocation2 + $0x90] sm:$0xff] %v1039_v60  }
  0xc6   :  { %1131 = vst [vmem:[#allocation2 + $0xd0] sm:$0xff] %v1079_v61   ;;  %v469_v0 = vpop.f32.mrf.mxu2  ;;  %v509_v1 = vpop.f32.mrf.mxu3 }
  0xc7   :  { %v391_v2 = vpop.f32.mrf.mxu0  ;;  %v431_v3 = vpop.f32.mrf.mxu1  ;;  %v470_v12 = vadd.f32 %v1339_v40, %v469_v0  ;;  %v510_v13 = vadd.f32 %v1339_v40, %v509_v1 }
  0xc8   :  { %v392_v4 = vadd.f32 %v1339_v40, %v391_v2  ;;  %v432_v5 = vadd.f32 %v1339_v40, %v431_v3 }
  0xc9   :  { %v572_v20 = vmax.f32 %v470_v12, 0.0  ;;  %v588_v21 = vmax.f32 %v510_v13, 0.0 }
  0xca   :  { %v541_v8 = vmax.f32 %v392_v4, 0.0  ;;  %v557_v9 = vmax.f32 %v432_v5, 0.0 }
  0xcc   :  { %v964_v10 = vpack.c.bf16 %v541_v8, %v540_v6  ;;  %v1004_v11 = vpack.c.bf16 %v557_v9, %v556_v7 }
  0xce   :  { %1108 = vst [vmem:[#allocation2 + $0x18] sm:$0xff] %v964_v10   ;;  %v471_v14 = vpop.f32.mrf.mxu2  ;;  %v511_v15 = vpop.f32.mrf.mxu3 }
  0xcf   :  { %1116 = vst [vmem:[#allocation2 + $0x58] sm:$0xff] %v1004_v11   ;;  %v472_v16 = vadd.f32 %v1339_v40, %v471_v14  ;;  %v512_v17 = vadd.f32 %v1339_v40, %v511_v15  ;;  %v394_v18 = vpop.f32.mrf.mxu0  ;;  %v434_v19 = vpop.f32.mrf.mxu1 }
  0xd0   :  { %v395_v26 = vadd.f32 %v1339_v40, %v394_v18  ;;  %v435_v27 = vadd.f32 %v1339_v40, %v434_v19 }
  0xd1   :  { %v573_v22 = vmax.f32 %v472_v16, 0.0  ;;  %v589_v23 = vmax.f32 %v512_v17, 0.0 }
  0xd2   :  { %v542_v34 = vmax.f32 %v395_v26, 0.0  ;;  %v558_v35 = vmax.f32 %v435_v27, 0.0 }
  0xd3   :  { %v1044_v24 = vpack.c.bf16 %v573_v22, %v572_v20  ;;  %v1084_v25 = vpack.c.bf16 %v589_v23, %v588_v21 }
  0xd5   :  { %1124 = vst [vmem:[#allocation2 + $0x98] sm:$0xff] %v1044_v24  }
  0xd6   :  { %1132 = vst [vmem:[#allocation2 + $0xd8] sm:$0xff] %v1084_v25   ;;  %v474_v28 = vpop.f32.mrf.mxu2  ;;  %v514_v29 = vpop.f32.mrf.mxu3 }
  0xd7   :  { %v396_v30 = vpop.f32.mrf.mxu0  ;;  %v436_v31 = vpop.f32.mrf.mxu1  ;;  %v475_v41 = vadd.f32 %v1339_v40, %v474_v28  ;;  %v515_v42 = vadd.f32 %v1339_v40, %v514_v29 }
  0xd8   :  { %v397_v32 = vadd.f32 %v1339_v40, %v396_v30  ;;  %v437_v33 = vadd.f32 %v1339_v40, %v436_v31 }
  0xd9   :  { %v574_v49 = vmax.f32 %v475_v41, 0.0  ;;  %v590_v50 = vmax.f32 %v515_v42, 0.0 }
  0xda   :  { %v543_v36 = vmax.f32 %v397_v32, 0.0  ;;  %v559_v37 = vmax.f32 %v437_v33, 0.0 }
  0xdc   :  { %v969_v38 = vpack.c.bf16 %v543_v36, %v542_v34  ;;  %v1009_v39 = vpack.c.bf16 %v559_v37, %v558_v35 }
  0xde   :  { %1109 = vst [vmem:[#allocation2 + $0x20] sm:$0xff] %v969_v38   ;;  %v476_v43 = vpop.f32.mrf.mxu2  ;;  %v516_v44 = vpop.f32.mrf.mxu3 }
  0xdf   :  { %1117 = vst [vmem:[#allocation2 + $0x60] sm:$0xff] %v1009_v39   ;;  %v477_v45 = vadd.f32 %v1339_v40, %v476_v43  ;;  %v517_v46 = vadd.f32 %v1339_v40, %v516_v44  ;;  %v399_v47 = vpop.f32.mrf.mxu0  ;;  %v439_v48 = vpop.f32.mrf.mxu1 }
  0xe0   :  { %v400_v55 = vadd.f32 %v1339_v40, %v399_v47  ;;  %v440_v56 = vadd.f32 %v1339_v40, %v439_v48 }
  0xe1   :  { %v575_v51 = vmax.f32 %v477_v45, 0.0  ;;  %v591_v52 = vmax.f32 %v517_v46, 0.0 }
  0xe2   :  { %v544_v63 = vmax.f32 %v400_v55, 0.0  ;;  %v560_v0 = vmax.f32 %v440_v56, 0.0 }
  0xe3   :  { %v1049_v53 = vpack.c.bf16 %v575_v51, %v574_v49  ;;  %v1089_v54 = vpack.c.bf16 %v591_v52, %v590_v50 }
  0xe5   :  { %1125 = vst [vmem:[#allocation2 + $0xa0] sm:$0xff] %v1049_v53  }
  0xe6   :  { %1133 = vst [vmem:[#allocation2 + $0xe0] sm:$0xff] %v1089_v54   ;;  %v479_v57 = vpop.f32.mrf.mxu2  ;;  %v519_v58 = vpop.f32.mrf.mxu3 }
  0xe7   :  { %v401_v59 = vpop.f32.mrf.mxu0  ;;  %v441_v60 = vpop.f32.mrf.mxu1  ;;  %v480_v5 = vadd.f32 %v1339_v40, %v479_v57  ;;  %v520_v6 = vadd.f32 %v1339_v40, %v519_v58 }
  0xe8   :  { %v402_v61 = vadd.f32 %v1339_v40, %v401_v59  ;;  %v442_v62 = vadd.f32 %v1339_v40, %v441_v60 }
  0xe9   :  { %v576_v13 = vmax.f32 %v480_v5, 0.0  ;;  %v592_v14 = vmax.f32 %v520_v6, 0.0 }
  0xea   :  { %v545_v1 = vmax.f32 %v402_v61, 0.0  ;;  %v561_v2 = vmax.f32 %v442_v62, 0.0 }
  0xec   :  { %v974_v3 = vpack.c.bf16 %v545_v1, %v544_v63  ;;  %v1014_v4 = vpack.c.bf16 %v561_v2, %v560_v0 }
  0xee   :  { %1110 = vst [vmem:[#allocation2 + $0x28] sm:$0xff] %v974_v3   ;;  %v481_v7 = vpop.f32.mrf.mxu2  ;;  %v521_v8 = vpop.f32.mrf.mxu3 }
  0xef   :  { %1118 = vst [vmem:[#allocation2 + $0x68] sm:$0xff] %v1014_v4   ;;  %v482_v9 = vadd.f32 %v1339_v40, %v481_v7  ;;  %v522_v10 = vadd.f32 %v1339_v40, %v521_v8  ;;  %v404_v11 = vpop.f32.mrf.mxu0  ;;  %v444_v12 = vpop.f32.mrf.mxu1 }
  0xf0   :  { %v405_v19 = vadd.f32 %v1339_v40, %v404_v11  ;;  %v445_v20 = vadd.f32 %v1339_v40, %v444_v12 }
  0xf1   :  { %v577_v15 = vmax.f32 %v482_v9, 0.0  ;;  %v593_v16 = vmax.f32 %v522_v10, 0.0 }
  0xf2   :  { %v546_v27 = vmax.f32 %v405_v19, 0.0  ;;  %v562_v28 = vmax.f32 %v445_v20, 0.0 }
  0xf3   :  { %v1054_v17 = vpack.c.bf16 %v577_v15, %v576_v13  ;;  %v1094_v18 = vpack.c.bf16 %v593_v16, %v592_v14 }
  0xf5   :  { %1126 = vst [vmem:[#allocation2 + $0xa8] sm:$0xff] %v1054_v17  }
  0xf6   :  { %1134 = vst [vmem:[#allocation2 + $0xe8] sm:$0xff] %v1094_v18   ;;  %v484_v21 = vpop.f32.mrf.mxu2  ;;  %v524_v22 = vpop.f32.mrf.mxu3 }
  0xf7   :  { %v406_v23 = vpop.f32.mrf.mxu0  ;;  %v446_v24 = vpop.f32.mrf.mxu1  ;;  %v485_v33 = vadd.f32 %v1339_v40, %v484_v21  ;;  %v525_v34 = vadd.f32 %v1339_v40, %v524_v22 }
  0xf8   :  { %v407_v25 = vadd.f32 %v1339_v40, %v406_v23  ;;  %v447_v26 = vadd.f32 %v1339_v40, %v446_v24 }
  0xf9   :  { %v578_v42 = vmax.f32 %v485_v33, 0.0  ;;  %v594_v43 = vmax.f32 %v525_v34, 0.0 }
  0xfa   :  { %v547_v29 = vmax.f32 %v407_v25, 0.0  ;;  %v563_v30 = vmax.f32 %v447_v26, 0.0 }
  0xfc   :  { %v979_v31 = vpack.c.bf16 %v547_v29, %v546_v27  ;;  %v1019_v32 = vpack.c.bf16 %v563_v30, %v562_v28 }
  0xfe   :  { %1111 = vst [vmem:[#allocation2 + $0x30] sm:$0xff] %v979_v31   ;;  %v486_v35 = vpop.f32.mrf.mxu2  ;;  %v526_v36 = vpop.f32.mrf.mxu3 }
  0xff   :  { %1119 = vst [vmem:[#allocation2 + $0x70] sm:$0xff] %v1019_v32   ;;  %v487_v37 = vadd.f32 %v1339_v40, %v486_v35  ;;  %v527_v38 = vadd.f32 %v1339_v40, %v526_v36  ;;  %v409_v39 = vpop.f32.mrf.mxu0  ;;  %v449_v41 = vpop.f32.mrf.mxu1 }
 0x100   :  { %v410_v48 = vadd.f32 %v1339_v40, %v409_v39  ;;  %v450_v49 = vadd.f32 %v1339_v40, %v449_v41 }
 0x101   :  { %v579_v44 = vmax.f32 %v487_v37, 0.0  ;;  %v595_v45 = vmax.f32 %v527_v38, 0.0 }
 0x102   :  { %v548_v56 = vmax.f32 %v410_v48, 0.0  ;;  %v564_v57 = vmax.f32 %v450_v49, 0.0 }
 0x103   :  { %v1059_v46 = vpack.c.bf16 %v579_v44, %v578_v42  ;;  %v1099_v47 = vpack.c.bf16 %v595_v45, %v594_v43 }
 0x105   :  { %1127 = vst [vmem:[#allocation2 + $0xb0] sm:$0xff] %v1059_v46  }
 0x106   :  { %1135 = vst [vmem:[#allocation2 + $0xf0] sm:$0xff] %v1099_v47   ;;  %v489_v50 = vpop.f32.mrf.mxu2  ;;  %v529_v51 = vpop.f32.mrf.mxu3 }
 0x107   :  { %v411_v52 = vpop.f32.mrf.mxu0  ;;  %v451_v53 = vpop.f32.mrf.mxu1  ;;  %v490_v62 = vadd.f32 %v1339_v40, %v489_v50  ;;  %v530_v63 = vadd.f32 %v1339_v40, %v529_v51 }
 0x108   :  { %v412_v54 = vadd.f32 %v1339_v40, %v411_v52  ;;  %v452_v55 = vadd.f32 %v1339_v40, %v451_v53 }
 0x109   :  { %v580_v4 = vmax.f32 %v490_v62, 0.0  ;;  %v596_v5 = vmax.f32 %v530_v63, 0.0 }
 0x10a   :  { %v549_v58 = vmax.f32 %v412_v54, 0.0  ;;  %v565_v59 = vmax.f32 %v452_v55, 0.0 }
 0x10c   :  { %v984_v60 = vpack.c.bf16 %v549_v58, %v548_v56  ;;  %v1024_v61 = vpack.c.bf16 %v565_v59, %v564_v57 }
 0x10e   :  { %1112 = vst [vmem:[#allocation2 + $0x38] sm:$0xff] %v984_v60   ;;  %v491_v0 = vpop.f32.mrf.mxu2  ;;  %v531_v1 = vpop.f32.mrf.mxu3 }
 0x10f   :  { %1120 = vst [vmem:[#allocation2 + $0x78] sm:$0xff] %v1024_v61   ;;  %v492_v2 = vadd.f32 %v1339_v40, %v491_v0  ;;  %v532_v3 = vadd.f32 %v1339_v40, %v531_v1 }
 0x111   :  { %v581_v6 = vmax.f32 %v492_v2, 0.0  ;;  %v597_v7 = vmax.f32 %v532_v3, 0.0 }
 0x113   :  { %v1064_v8 = vpack.c.bf16 %v581_v6, %v580_v4  ;;  %v1104_v9 = vpack.c.bf16 %v597_v7, %v596_v5 }
 0x115   :  { %1128 = vst [vmem:[#allocation2 + $0xb8] sm:$0xff] %v1064_v8  }
 0x116   :  { %1136 = vst [vmem:[#allocation2 + $0xf8] sm:$0xff] %v1104_v9  }
 0x117   :  { %738 = dma.vmem_to_hbm [thread:$0]  %s731_s2, 4096, %s733_s29, [#allocation3], %s1177_s30, %s1177_s30, %s1178_s4  }
 0x118   :  { %1174 = dma.done.wait [#allocation3], 4096  }
 0x119   :  { %1175 = vsyncadd [#allocation3], 4294963200 }
 0x11a   :  { %743 = vsyncpa [#allocation3], 1 }

</bundles_post_ra>
